<compile_context>
chip_gen: v7x
topology: tpu7x:2x2x1
jax: 0.10.0
libtpu: 0.0.40
codegen_flags: <defaults>
</compile_context>

<pallas_src>
import functools

import numpy as np
import jax
import jax.numpy as jnp
from jax import lax
from jax.experimental import pallas as pl
from jax.experimental.pallas import tpu as pltpu


# ---------------------------------------------------------------------------
# Host-side precomputed operators (static shapes -> built at trace time).
# ---------------------------------------------------------------------------

def _upsample_matrix(n_in, n_out):
    """Bilinear align_corners=True interpolation matrix, shape (n_out, n_in)."""
    u = np.zeros((n_out, n_in), np.float32)
    if n_in == 1 or n_out == 1:
        u[:, 0] = 1.0
        return u
    for j in range(n_out):
        src = j * (n_in - 1) / (n_out - 1)
        lo = min(int(np.floor(src)), n_in - 1)
        hi = min(lo + 1, n_in - 1)
        frac = np.float32(src - lo)
        u[j, lo] += 1.0 - frac
        u[j, hi] += frac
    return u


def _upsample_pad_matrix(h1, w1, h2, w2):
    """(h1*w1, h2*w2) matrix: bilinear x2 upsample + asymmetric zero pad.

    padded_upsample(x).reshape(C, h2*w2) == x.reshape(C, h1*w1) @ U
    """
    h_up, w_up = 2 * h1, 2 * w1
    pad_t = (h2 - h_up) // 2
    pad_l = (w2 - w_up) // 2
    uy = _upsample_matrix(h1, h_up)           # (h_up, h1)
    ux = _upsample_matrix(w1, w_up)           # (w_up, w1)
    k = np.einsum('Hh,Ww->hwHW', uy, ux)      # (h1, w1, h_up, w_up)
    full = np.zeros((h1, w1, h2, w2), np.float32)
    full[:, :, pad_t:pad_t + h_up, pad_l:pad_l + w_up] = k
    return full.reshape(h1 * w1, h2 * w2)


def _tap_masks(h, w):
    """(9, h*w) 0/1 border masks for the 9 taps of a padding=1 3x3 conv."""
    row = np.repeat(np.arange(h), w)
    col = np.tile(np.arange(w), h)
    masks = np.zeros((9, h * w), np.float32)
    t = 0
    for dy in (-1, 0, 1):
        for dx in (-1, 0, 1):
            ok = ((row + dy >= 0) & (row + dy < h) &
                  (col + dx >= 0) & (col + dx < w))
            masks[t] = ok.astype(np.float32)
            t += 1
    return masks


# ---------------------------------------------------------------------------
# Fused Up kernel: upsample+pad matmul -> concat -> 2x (3x3 conv + bias + ReLU)
# ---------------------------------------------------------------------------

def _up_fused_kernel(x1_ref, x2_ref, u_ref, m_ref,
                     w1_ref, b1_ref, w2_ref, b2_ref, o_ref, *, dims):
    h, w, cin, mid = dims
    hw = h * w

    # ---- bilinear x2 upsample + pad: ONE matmul, lane-dense output ---------
    x1_up = jnp.dot(x1_ref[0], u_ref[...],
                    preferred_element_type=jnp.float32)        # (c1, hw) f32

    # ---- channel concat (sublane axis only), matches torch.cat([x2, x1]) ---
    x = jnp.concatenate([x2_ref[0], x1_up], axis=0)            # (cin, hw) f32

    def conv3x3_bias_relu(xin, w_ref, b_ref, c_in):
        """3x3 same-pad conv via lane rolls + border masks, + bias + ReLU."""
        taps = []
        ti = 0
        for dy in (-1, 0, 1):
            for dx in (-1, 0, 1):
                s = dy * w + dx                    # flat source offset
                t = xin if s == 0 else pltpu.roll(xin, shift=(-s) % hw, axis=1)
                if s != 0:
                    t = t * m_ref[ti:ti + 1, :]    # zero wrapped border pixels
                taps.append(t)
                ti += 1
        c_out = w_ref.shape[0]
        if c_in < 32:
            # Small Cin: single K=9*Cin im2col matmul (K-depth for the MXU).
            patches = jnp.concatenate(taps, axis=0).astype(jnp.bfloat16)
            acc = jnp.dot(w_ref[...], patches,
                          preferred_element_type=jnp.float32)
        else:
            # Large Cin: tap-wise accumulation, never materialize 9x im2col.
            acc = jnp.zeros((c_out, hw), jnp.float32)
            for t_idx in range(9):
                acc = acc + jnp.dot(
                    w_ref[:, t_idx * c_in:(t_idx + 1) * c_in],
                    taps[t_idx].astype(jnp.bfloat16),
                    preferred_element_type=jnp.float32)
        # BN scale already folded into weights; epilogue is bias + ReLU only.
        return jnp.maximum(acc + b_ref[...], 0.0)

    hid = conv3x3_bias_relu(x, w1_ref, b1_ref, cin)            # (mid, hw)  f32
    y = conv3x3_bias_relu(hid, w2_ref, b2_ref, mid)            # (cout, hw) f32

    # Lane-dense store: (cout, H*W) with H*W a multiple of 128.
    o_ref[0] = y.astype(o_ref.dtype)


def up_forward(params, x1_nchw, x2_nchw):
    """Forward of Up (bilinear=True).  NCHW in / NCHW out, like PyTorch."""
    x1 = x1_nchw.astype(jnp.float32)
    x2 = x2_nchw.astype(jnp.float32)
    n, c1, h1, w1 = x1.shape
    n2, c2, h2, w2 = x2.shape
    assert n == n2
    assert h2 >= 2 * h1 and w2 >= 2 * w1
    cin = c1 + c2
    mid = params["w1t"].shape[0]
    cout = params["w2t"].shape[0]
    hw = h2 * w2
    h1w1 = h1 * w1

    # Lane-dense inputs: (N, C, H*W)  (free host-side reshapes).
    x1f = x1.reshape(n, c1, h1w1)
    x2f = x2.reshape(n, c2, hw)

    # Host-precomputed operators.
    u = jnp.asarray(_upsample_pad_matrix(h1, w1, h2, w2))      # (h1w1, hw)
    masks = jnp.asarray(_tap_masks(h2, w2))                    # (9, hw)

    # Fold BN scale into the conv weights (eval mode); cast once to bf16.
    cw1 = (params["w1t"] * params["scale1"]).astype(jnp.bfloat16)   # (mid, 9*cin)
    cw2 = (params["w2t"] * params["scale2"]).astype(jnp.bfloat16)   # (cout, 9*mid)
    b1 = params["bias1"]
    b2 = params["bias2"]

    kernel = functools.partial(_up_fused_kernel, dims=(h2, w2, cin, mid))

    out_flat = pl.pallas_call(
        kernel,
        out_shape=jax.ShapeDtypeStruct((n, cout, hw), jnp.float32),
        grid_spec=pltpu.PrefetchScalarGridSpec(
            num_scalar_prefetch=0,
            grid=(n,),
            in_specs=[
                pl.BlockSpec((1, c1, h1w1), lambda b: (b, 0, 0)),   # x1 lane-dense
                pl.BlockSpec((1, c2, hw), lambda b: (b, 0, 0)),     # x2 lane-dense
                pl.BlockSpec((h1w1, hw), lambda b: (0, 0)),         # upsample+pad mat
                pl.BlockSpec((9, hw), lambda b: (0, 0)),            # border masks
                pl.BlockSpec((mid, 9 * cin), lambda b: (0, 0)),     # conv1 W (BN-folded)
                pl.BlockSpec((mid, 1), lambda b: (0, 0)),           # conv1 bias
                pl.BlockSpec((cout, 9 * mid), lambda b: (0, 0)),    # conv2 W (BN-folded)
                pl.BlockSpec((cout, 1), lambda b: (0, 0)),          # conv2 bias
            ],
            out_specs=pl.BlockSpec((1, cout, hw), lambda b: (b, 0, 0)),
        ),
        compiler_params=pltpu.CompilerParams(
            dimension_semantics=("parallel",),
            # Tiny footprint at test sizes; raise (v5e/v6e) or H-tile (v7x,
            # 64 MiB physical VMEM) for real UNet shapes -- see TODOs above.
            vmem_limit_bytes=32 * 1024 * 1024,
        ),
    )(x1f, x2f, u, masks, cw1, b1, cw2, b2)

    return out_flat.reshape(n, cout, h2, w2)   # free reshape -> NCHW


# ---------------------------------------------------------------------------
# Parameters + pure-JAX reference
# ---------------------------------------------------------------------------

def fold_bn(conv_b, gamma, beta, mean, var, eps=1e-5):
    scale = gamma / jnp.sqrt(var + eps)
    bias = (conv_b - mean) * scale + beta
    return scale, bias


def init_up_params(key, in_channels, out_channels):
    """Up(in_channels, out_channels, bilinear=True) parameters (deterministic)."""
    mid = in_channels // 2
    ks = jax.random.split(key, 10)

    def normal(k, shape, s=0.1):
        return (s * jax.random.normal(k, shape)).astype(jnp.float32)

    def to_wt(w_hwio):  # (3,3,Cin,Cout) -> (Cout, 9*Cin), tap-major channel-minor
        ci = w_hwio.shape[-2]
        co = w_hwio.shape[-1]
        return jnp.transpose(w_hwio.reshape(9, ci, co), (2, 0, 1)).reshape(co, 9 * ci)

    # conv1: Conv2d(in_channels, mid, 3, padding=1) + BatchNorm2d(mid)
    w1 = normal(ks[0], (3, 3, in_channels, mid))
    b1 = normal(ks[1], (mid,))
    g1 = 1.0 + normal(ks[2], (mid,))
    be1 = normal(ks[3], (mid,))
    m1 = normal(ks[4], (mid,))
    v1 = 0.5 + jax.random.uniform(ks[5], (mid,), dtype=jnp.float32)
    s1, bb1 = fold_bn(b1, g1, be1, m1, v1)

    # conv2: Conv2d(mid, out_channels, 3, padding=1) + BatchNorm2d(out_channels)
    w2 = normal(ks[6], (3, 3, mid, out_channels))
    b2 = normal(ks[7], (out_channels,))
    g2 = 1.0 + normal(ks[8], (out_channels,))
    be2 = normal(ks[9], (out_channels,))
    m2 = jnp.zeros((out_channels,), jnp.float32)
    v2 = jnp.ones((out_channels,), jnp.float32)
    s2, bb2 = fold_bn(b2, g2, be2, m2, v2)

    return {
        "w1t": to_wt(w1),                         # f32; BN scale folded at call
        "scale1": s1.reshape(mid, 1),
        "bias1": bb1.reshape(mid, 1),
        "w2t": to_wt(w2),
        "scale2": s2.reshape(out_channels, 1),
        "bias2": bb2.reshape(out_channels, 1),
    }


def up_reference(params, x1_nchw, x2_nchw):
    """Pure-JAX (XLA) reference of the same forward pass, f32 everywhere."""
    x1 = x1_nchw.astype(jnp.float32)
    x2 = x2_nchw.astype(jnp.float32)
    _, c1, h1, w1 = x1.shape
    _, c2, h2, w2 = x2.shape
    h_up, w_up = 2 * h1, 2 * w1
    uy = jnp.asarray(_upsample_matrix(h1, h_up))
    ux = jnp.asarray(_upsample_matrix(w1, w_up))
    x1u = jnp.einsum('nchw,Hh,Ww->ncHW', x1, uy, ux)
    dy, dx = h2 - h_up, w2 - w_up
    x1u = jnp.pad(x1u, ((0, 0), (0, 0),
                        (dy // 2, dy - dy // 2),
                        (dx // 2, dx - dx // 2)))
    x = jnp.concatenate([x2, x1u], axis=1)

    def conv_bn_relu(x, wt, scale, bias):
        co = wt.shape[0]
        ci = wt.shape[1] // 9
        w = wt.astype(jnp.float32).reshape(co, 3, 3, ci)
        w = jnp.transpose(w, (0, 3, 1, 2))                    # OIHW
        y = lax.conv_general_dilated(
            x, w, window_strides=(1, 1), padding=((1, 1), (1, 1)),
            dimension_numbers=('NCHW', 'OIHW', 'NCHW'),
            precision=lax.Precision.HIGHEST)
        y = y * scale.reshape(1, co, 1, 1) + bias.reshape(1, co, 1, 1)
        return jnp.maximum(y, 0.0)

    y = conv_bn_relu(x, params["w1t"], params["scale1"], params["bias1"])
    y = conv_bn_relu(y, params["w2t"], params["scale2"], params["bias2"])
    return y


if __name__ == "__main__":
    in_channels = 8      # channels(x2 skip) + channels(upsampled x1)
    out_channels = 4
    key = jax.random.PRNGKey(0)
    kp, k1, k2 = jax.random.split(key, 3)

    params = init_up_params(kp, in_channels, out_channels)

    # x1: deeper feature map (lower resolution), x2: skip connection.
    x1 = jax.random.normal(k1, (2, in_channels // 2, 8, 8), jnp.float32)
    x2 = jax.random.normal(k2, (2, in_channels // 2, 16, 16), jnp.float32)

    out = jax.jit(up_forward)(params, x1, x2)
    out = jax.block_until_ready(out)
    assert out.shape == (2, out_channels, 16, 16), out.shape
    assert bool(jnp.all(jnp.isfinite(out)))

    ref = up_reference(params, x1, x2)
    err = float(jnp.max(jnp.abs(out - ref)))
    assert err < 5e-2, f"max abs error vs reference: {err}"
    print("KERNEL_OK")
</pallas_src>

<mosaic_0001>
module attributes {stable_mosaic.version = 11 : i64} {
  func.func @_up_fused_kernel(%arg0: i32, %arg1: memref<1x4x64xf32, #tpu.memory_space<vmem>>, %arg2: memref<1x4x256xf32, #tpu.memory_space<vmem>>, %arg3: memref<64x256xf32, #tpu.memory_space<vmem>>, %arg4: memref<9x256xf32, #tpu.memory_space<vmem>>, %arg5: memref<4x72xbf16, #tpu.memory_space<vmem>>, %arg6: memref<4x1xf32, #tpu.memory_space<vmem>>, %arg7: memref<4x36xbf16, #tpu.memory_space<vmem>>, %arg8: memref<4x1xf32, #tpu.memory_space<vmem>>, %arg9: memref<1x4x256xf32, #tpu.memory_space<vmem>>) attributes {dimension_semantics = [#tpu.dimension_semantics<parallel>], iteration_bounds = array<i64: 2>, scalar_prefetch = 0 : i64, scratch_operands = 0 : i64, tpu.core_type = #tpu.core_type<tc>, window_params = [{transform_indices = @transform_0, window_bounds = array<i64: 1, 4, 64>}, {transform_indices = @transform_1, window_bounds = array<i64: 1, 4, 256>}, {pipeline_mode = #tpu.pipeline_mode<synchronous>, transform_indices = @transform_2, window_bounds = array<i64: 64, 256>}, {pipeline_mode = #tpu.pipeline_mode<synchronous>, transform_indices = @transform_3, window_bounds = array<i64: 9, 256>}, {pipeline_mode = #tpu.pipeline_mode<synchronous>, transform_indices = @transform_4, window_bounds = array<i64: 4, 72>}, {pipeline_mode = #tpu.pipeline_mode<synchronous>, transform_indices = @transform_5, window_bounds = array<i64: 4, 1>}, {pipeline_mode = #tpu.pipeline_mode<synchronous>, transform_indices = @transform_6, window_bounds = array<i64: 4, 36>}, {pipeline_mode = #tpu.pipeline_mode<synchronous>, transform_indices = @transform_7, window_bounds = array<i64: 4, 1>}, {transform_indices = @transform_8, window_bounds = array<i64: 1, 4, 256>}]} {
    %c0 = arith.constant 0 : index
    %c0_0 = arith.constant 0 : index
    %c0_1 = arith.constant 0 : index
    %0 = vector.load %arg1[%c0, %c0_0, %c0_1] : memref<1x4x64xf32, #tpu.memory_space<vmem>>, vector<1x4x64xf32>
    %1 = vector.shape_cast %0 : vector<1x4x64xf32> to vector<4x64xf32>
    %c0_2 = arith.constant 0 : index
    %c0_3 = arith.constant 0 : index
    %2 = vector.load %arg3[%c0_2, %c0_3] : memref<64x256xf32, #tpu.memory_space<vmem>>, vector<64x256xf32>
    %cst = arith.constant dense<0.000000e+00> : vector<4x256xf32>
    %3 = tpu.matmul %1, %2, %cst {dimension_numbers = #tpu.dot_dimension_numbers<[1], [0], [0], [1], [0, 0, 1, 1], [], []>} : vector<4x64xf32>, vector<64x256xf32>, vector<4x256xf32> -> vector<4x256xf32>
    %c0_4 = arith.constant 0 : index
    %c0_5 = arith.constant 0 : index
    %c0_6 = arith.constant 0 : index
    %4 = vector.load %arg2[%c0_4, %c0_5, %c0_6] : memref<1x4x256xf32, #tpu.memory_space<vmem>>, vector<1x4x256xf32>
    %5 = vector.shape_cast %4 : vector<1x4x256xf32> to vector<4x256xf32>
    %6 = tpu.concatenate %5, %3 in 0 : vector<4x256xf32>, vector<4x256xf32> -> vector<8x256xf32>
    %c17_i32 = arith.constant 17 : i32
    %7 = tpu.dynamic_rotate %6 by %c17_i32 dim 1 : vector<8x256xf32>, i32 -> vector<8x256xf32>
    %c0_7 = arith.constant 0 : index
    %c0_8 = arith.constant 0 : index
    %8 = vector.load %arg4[%c0_7, %c0_8] : memref<9x256xf32, #tpu.memory_space<vmem>>, vector<1x256xf32>
    %9 = vector.broadcast %8 : vector<1x256xf32> to vector<8x256xf32>
    %10 = arith.mulf %7, %9 : vector<8x256xf32>
    %c16_i32 = arith.constant 16 : i32
    %11 = tpu.dynamic_rotate %6 by %c16_i32 dim 1 : vector<8x256xf32>, i32 -> vector<8x256xf32>
    %c1 = arith.constant 1 : index
    %c0_9 = arith.constant 0 : index
    %12 = vector.load %arg4[%c1, %c0_9] : memref<9x256xf32, #tpu.memory_space<vmem>>, vector<1x256xf32>
    %13 = vector.broadcast %12 : vector<1x256xf32> to vector<8x256xf32>
    %14 = arith.mulf %11, %13 : vector<8x256xf32>
    %c15_i32 = arith.constant 15 : i32
    %15 = tpu.dynamic_rotate %6 by %c15_i32 dim 1 : vector<8x256xf32>, i32 -> vector<8x256xf32>
    %c2 = arith.constant 2 : index
    %c0_10 = arith.constant 0 : index
    %16 = vector.load %arg4[%c2, %c0_10] : memref<9x256xf32, #tpu.memory_space<vmem>>, vector<1x256xf32>
    %17 = vector.broadcast %16 : vector<1x256xf32> to vector<8x256xf32>
    %18 = arith.mulf %15, %17 : vector<8x256xf32>
    %c1_i32 = arith.constant 1 : i32
    %19 = tpu.dynamic_rotate %6 by %c1_i32 dim 1 : vector<8x256xf32>, i32 -> vector<8x256xf32>
    %c3 = arith.constant 3 : index
    %c0_11 = arith.constant 0 : index
    %20 = vector.load %arg4[%c3, %c0_11] : memref<9x256xf32, #tpu.memory_space<vmem>>, vector<1x256xf32>
    %21 = vector.broadcast %20 : vector<1x256xf32> to vector<8x256xf32>
    %22 = arith.mulf %19, %21 : vector<8x256xf32>
    %c255_i32 = arith.constant 255 : i32
    %23 = tpu.dynamic_rotate %6 by %c255_i32 dim 1 : vector<8x256xf32>, i32 -> vector<8x256xf32>
    %c5 = arith.constant 5 : index
    %c0_12 = arith.constant 0 : index
    %24 = vector.load %arg4[%c5, %c0_12] : memref<9x256xf32, #tpu.memory_space<vmem>>, vector<1x256xf32>
    %25 = vector.broadcast %24 : vector<1x256xf32> to vector<8x256xf32>
    %26 = arith.mulf %23, %25 : vector<8x256xf32>
    %c241_i32 = arith.constant 241 : i32
    %27 = tpu.dynamic_rotate %6 by %c241_i32 dim 1 : vector<8x256xf32>, i32 -> vector<8x256xf32>
    %c6 = arith.constant 6 : index
    %c0_13 = arith.constant 0 : index
    %28 = vector.load %arg4[%c6, %c0_13] : memref<9x256xf32, #tpu.memory_space<vmem>>, vector<1x256xf32>
    %29 = vector.broadcast %28 : vector<1x256xf32> to vector<8x256xf32>
    %30 = arith.mulf %27, %29 : vector<8x256xf32>
    %c240_i32 = arith.constant 240 : i32
    %31 = tpu.dynamic_rotate %6 by %c240_i32 dim 1 : vector<8x256xf32>, i32 -> vector<8x256xf32>
    %c7 = arith.constant 7 : index
    %c0_14 = arith.constant 0 : index
    %32 = vector.load %arg4[%c7, %c0_14] : memref<9x256xf32, #tpu.memory_space<vmem>>, vector<1x256xf32>
    %33 = vector.broadcast %32 : vector<1x256xf32> to vector<8x256xf32>
    %34 = arith.mulf %31, %33 : vector<8x256xf32>
    %c239_i32 = arith.constant 239 : i32
    %35 = tpu.dynamic_rotate %6 by %c239_i32 dim 1 : vector<8x256xf32>, i32 -> vector<8x256xf32>
    %c8 = arith.constant 8 : index
    %c0_15 = arith.constant 0 : index
    %36 = vector.load %arg4[%c8, %c0_15] : memref<9x256xf32, #tpu.memory_space<vmem>>, vector<1x256xf32>
    %37 = vector.broadcast %36 : vector<1x256xf32> to vector<8x256xf32>
    %38 = arith.mulf %35, %37 : vector<8x256xf32>
    %39 = tpu.concatenate %10, %14, %18, %22, %6, %26, %30, %34, %38 in 0 : vector<8x256xf32>, vector<8x256xf32>, vector<8x256xf32>, vector<8x256xf32>, vector<8x256xf32>, vector<8x256xf32>, vector<8x256xf32>, vector<8x256xf32>, vector<8x256xf32> -> vector<72x256xf32>
    %40 = arith.truncf %39 : vector<72x256xf32> to vector<72x256xbf16>
    %c0_16 = arith.constant 0 : index
    %c0_17 = arith.constant 0 : index
    %41 = vector.load %arg5[%c0_16, %c0_17] : memref<4x72xbf16, #tpu.memory_space<vmem>>, vector<4x72xbf16>
    %cst_18 = arith.constant dense<0.000000e+00> : vector<4x256xf32>
    %42 = tpu.matmul %41, %40, %cst_18 {dimension_numbers = #tpu.dot_dimension_numbers<[1], [0], [0], [1], [0, 0, 1, 1], [], []>} : vector<4x72xbf16>, vector<72x256xbf16>, vector<4x256xf32> -> vector<4x256xf32>
    %c0_19 = arith.constant 0 : index
    %c0_20 = arith.constant 0 : index
    %43 = vector.load %arg6[%c0_19, %c0_20] : memref<4x1xf32, #tpu.memory_space<vmem>>, vector<4x1xf32>
    %44 = vector.broadcast %43 : vector<4x1xf32> to vector<4x256xf32>
    %45 = arith.addf %42, %44 : vector<4x256xf32>
    %cst_21 = arith.constant 0.000000e+00 : f32
    %46 = vector.broadcast %cst_21 : f32 to vector<4x256xf32>
    %47 = arith.maximumf %45, %46 : vector<4x256xf32>
    %c17_i32_22 = arith.constant 17 : i32
    %48 = tpu.dynamic_rotate %47 by %c17_i32_22 dim 1 : vector<4x256xf32>, i32 -> vector<4x256xf32>
    %c0_23 = arith.constant 0 : index
    %c0_24 = arith.constant 0 : index
    %49 = vector.load %arg4[%c0_23, %c0_24] : memref<9x256xf32, #tpu.memory_space<vmem>>, vector<1x256xf32>
    %50 = vector.broadcast %49 : vector<1x256xf32> to vector<4x256xf32>
    %51 = arith.mulf %48, %50 : vector<4x256xf32>
    %c16_i32_25 = arith.constant 16 : i32
    %52 = tpu.dynamic_rotate %47 by %c16_i32_25 dim 1 : vector<4x256xf32>, i32 -> vector<4x256xf32>
    %c1_26 = arith.constant 1 : index
    %c0_27 = arith.constant 0 : index
    %53 = vector.load %arg4[%c1_26, %c0_27] : memref<9x256xf32, #tpu.memory_space<vmem>>, vector<1x256xf32>
    %54 = vector.broadcast %53 : vector<1x256xf32> to vector<4x256xf32>
    %55 = arith.mulf %52, %54 : vector<4x256xf32>
    %c15_i32_28 = arith.constant 15 : i32
    %56 = tpu.dynamic_rotate %47 by %c15_i32_28 dim 1 : vector<4x256xf32>, i32 -> vector<4x256xf32>
    %c2_29 = arith.constant 2 : index
    %c0_30 = arith.constant 0 : index
    %57 = vector.load %arg4[%c2_29, %c0_30] : memref<9x256xf32, #tpu.memory_space<vmem>>, vector<1x256xf32>
    %58 = vector.broadcast %57 : vector<1x256xf32> to vector<4x256xf32>
    %59 = arith.mulf %56, %58 : vector<4x256xf32>
    %c1_i32_31 = arith.constant 1 : i32
    %60 = tpu.dynamic_rotate %47 by %c1_i32_31 dim 1 : vector<4x256xf32>, i32 -> vector<4x256xf32>
    %c3_32 = arith.constant 3 : index
    %c0_33 = arith.constant 0 : index
    %61 = vector.load %arg4[%c3_32, %c0_33] : memref<9x256xf32, #tpu.memory_space<vmem>>, vector<1x256xf32>
    %62 = vector.broadcast %61 : vector<1x256xf32> to vector<4x256xf32>
    %63 = arith.mulf %60, %62 : vector<4x256xf32>
    %c255_i32_34 = arith.constant 255 : i32
    %64 = tpu.dynamic_rotate %47 by %c255_i32_34 dim 1 : vector<4x256xf32>, i32 -> vector<4x256xf32>
    %c5_35 = arith.constant 5 : index
    %c0_36 = arith.constant 0 : index
    %65 = vector.load %arg4[%c5_35, %c0_36] : memref<9x256xf32, #tpu.memory_space<vmem>>, vector<1x256xf32>
    %66 = vector.broadcast %65 : vector<1x256xf32> to vector<4x256xf32>
    %67 = arith.mulf %64, %66 : vector<4x256xf32>
    %c241_i32_37 = arith.constant 241 : i32
    %68 = tpu.dynamic_rotate %47 by %c241_i32_37 dim 1 : vector<4x256xf32>, i32 -> vector<4x256xf32>
    %c6_38 = arith.constant 6 : index
    %c0_39 = arith.constant 0 : index
    %69 = vector.load %arg4[%c6_38, %c0_39] : memref<9x256xf32, #tpu.memory_space<vmem>>, vector<1x256xf32>
    %70 = vector.broadcast %69 : vector<1x256xf32> to vector<4x256xf32>
    %71 = arith.mulf %68, %70 : vector<4x256xf32>
    %c240_i32_40 = arith.constant 240 : i32
    %72 = tpu.dynamic_rotate %47 by %c240_i32_40 dim 1 : vector<4x256xf32>, i32 -> vector<4x256xf32>
    %c7_41 = arith.constant 7 : index
    %c0_42 = arith.constant 0 : index
    %73 = vector.load %arg4[%c7_41, %c0_42] : memref<9x256xf32, #tpu.memory_space<vmem>>, vector<1x256xf32>
    %74 = vector.broadcast %73 : vector<1x256xf32> to vector<4x256xf32>
    %75 = arith.mulf %72, %74 : vector<4x256xf32>
    %c239_i32_43 = arith.constant 239 : i32
    %76 = tpu.dynamic_rotate %47 by %c239_i32_43 dim 1 : vector<4x256xf32>, i32 -> vector<4x256xf32>
    %c8_44 = arith.constant 8 : index
    %c0_45 = arith.constant 0 : index
    %77 = vector.load %arg4[%c8_44, %c0_45] : memref<9x256xf32, #tpu.memory_space<vmem>>, vector<1x256xf32>
    %78 = vector.broadcast %77 : vector<1x256xf32> to vector<4x256xf32>
    %79 = arith.mulf %76, %78 : vector<4x256xf32>
    %80 = tpu.concatenate %51, %55, %59, %63, %47, %67, %71, %75, %79 in 0 : vector<4x256xf32>, vector<4x256xf32>, vector<4x256xf32>, vector<4x256xf32>, vector<4x256xf32>, vector<4x256xf32>, vector<4x256xf32>, vector<4x256xf32>, vector<4x256xf32> -> vector<36x256xf32>
    %81 = arith.truncf %80 : vector<36x256xf32> to vector<36x256xbf16>
    %c0_46 = arith.constant 0 : index
    %c0_47 = arith.constant 0 : index
    %82 = vector.load %arg7[%c0_46, %c0_47] : memref<4x36xbf16, #tpu.memory_space<vmem>>, vector<4x36xbf16>
    %cst_48 = arith.constant dense<0.000000e+00> : vector<4x256xf32>
    %83 = tpu.matmul %82, %81, %cst_48 {dimension_numbers = #tpu.dot_dimension_numbers<[1], [0], [0], [1], [0, 0, 1, 1], [], []>} : vector<4x36xbf16>, vector<36x256xbf16>, vector<4x256xf32> -> vector<4x256xf32>
    %c0_49 = arith.constant 0 : index
    %c0_50 = arith.constant 0 : index
    %84 = vector.load %arg8[%c0_49, %c0_50] : memref<4x1xf32, #tpu.memory_space<vmem>>, vector<4x1xf32>
    %85 = vector.broadcast %84 : vector<4x1xf32> to vector<4x256xf32>
    %86 = arith.addf %83, %85 : vector<4x256xf32>
    %cst_51 = arith.constant 0.000000e+00 : f32
    %87 = vector.broadcast %cst_51 : f32 to vector<4x256xf32>
    %88 = arith.maximumf %86, %87 : vector<4x256xf32>
    %c0_52 = arith.constant 0 : index
    %c0_53 = arith.constant 0 : index
    %c0_54 = arith.constant 0 : index
    %89 = vector.load %arg9[%c0_52, %c0_53, %c0_54] : memref<1x4x256xf32, #tpu.memory_space<vmem>>, vector<1x4x256xf32>
    %90 = vector.shape_cast %89 : vector<1x4x256xf32> to vector<4x256xf32>
    %91 = vector.shape_cast %88 : vector<4x256xf32> to vector<1x4x256xf32>
    tpu.vector_store %arg9[%c0_52, %c0_53, %c0_54], %91 {strides = array<i32>} : memref<1x4x256xf32, #tpu.memory_space<vmem>>, vector<1x4x256xf32>,
    return
  }
  func.func @transform_0(%arg0: i32) -> (i32, i32, i32) {
    %c0_i32 = arith.constant 0 : i32
    %c0_i32_0 = arith.constant 0 : i32
    %c0_i32_1 = arith.constant 0 : i32
    return %arg0, %c0_i32, %c0_i32_0 : i32, i32, i32
  }
  func.func @transform_1(%arg0: i32) -> (i32, i32, i32) {
    %c0_i32 = arith.constant 0 : i32
    %c0_i32_0 = arith.constant 0 : i32
    %c0_i32_1 = arith.constant 0 : i32
    return %arg0, %c0_i32, %c0_i32_0 : i32, i32, i32
  }
  func.func @transform_2(%arg0: i32) -> (i32, i32) {
    %c0_i32 = arith.constant 0 : i32
    %c0_i32_0 = arith.constant 0 : i32
    %c0_i32_1 = arith.constant 0 : i32
    return %c0_i32, %c0_i32_0 : i32, i32
  }
  func.func @transform_3(%arg0: i32) -> (i32, i32) {
    %c0_i32 = arith.constant 0 : i32
    %c0_i32_0 = arith.constant 0 : i32
    %c0_i32_1 = arith.constant 0 : i32
    return %c0_i32, %c0_i32_0 : i32, i32
  }
  func.func @transform_4(%arg0: i32) -> (i32, i32) {
    %c0_i32 = arith.constant 0 : i32
    %c0_i32_0 = arith.constant 0 : i32
    %c0_i32_1 = arith.constant 0 : i32
    return %c0_i32, %c0_i32_0 : i32, i32
  }
  func.func @transform_5(%arg0: i32) -> (i32, i32) {
    %c0_i32 = arith.constant 0 : i32
    %c0_i32_0 = arith.constant 0 : i32
    %c0_i32_1 = arith.constant 0 : i32
    return %c0_i32, %c0_i32_0 : i32, i32
  }
  func.func @transform_6(%arg0: i32) -> (i32, i32) {
    %c0_i32 = arith.constant 0 : i32
    %c0_i32_0 = arith.constant 0 : i32
    %c0_i32_1 = arith.constant 0 : i32
    return %c0_i32, %c0_i32_0 : i32, i32
  }
  func.func @transform_7(%arg0: i32) -> (i32, i32) {
    %c0_i32 = arith.constant 0 : i32
    %c0_i32_0 = arith.constant 0 : i32
    %c0_i32_1 = arith.constant 0 : i32
    return %c0_i32, %c0_i32_0 : i32, i32
  }
  func.func @transform_8(%arg0: i32) -> (i32, i32, i32) {
    %c0_i32 = arith.constant 0 : i32
    %c0_i32_0 = arith.constant 0 : i32
    %c0_i32_1 = arith.constant 0 : i32
    return %arg0, %c0_i32, %c0_i32_0 : i32, i32, i32
  }
}

</mosaic_0001>

<bundles_post_ra>
// kernel: up_forward.1
= control target key start
LH: loop header
LB: loop body
LE: loop exit
PB: predicated region body
PF: predicated region fallthrough
CT: control target
= control target key end

     0   :  { %13 = vsyncpa [#allocation3], 0  ;;  %s1106_s27 = smov 0   ;;  %s1479_s0 = inlined_call_operand.vmem [shape: f32[2,4,64], index: 0, kind: input, shape index: {}]   ;;  %s1480_s1 = inlined_call_operand.vmem [shape: f32[2,4,256], index: 1, kind: input, shape index: {}]   ;;  %s1481_s2 = inlined_call_operand.vmem [shape: f32[64,256], index: 2, kind: input, shape index: {}]   ;;  %s1482_s3 = inlined_call_operand.hbm [shape: f32[9,256], index: 3, kind: input, shape index: {}]   ;;  %s1483_s4 = inlined_call_operand.vmem [shape: bf16[4,72], index: 4, kind: input, shape index: {}]   ;;  %s1484_s5 = inlined_call_operand.vmem [shape: f32[4,1], index: 5, kind: input, shape index: {}]   ;;  %s1485_s6 = inlined_call_operand.vmem [shape: bf16[4,36], index: 6, kind: input, shape index: {}]   ;;  %s1486_s7 = inlined_call_operand.vmem [shape: f32[4,1], index: 7, kind: input, shape index: {}]   ;;  %s1487_s8 = inlined_call_operand.vmem [shape: f32[2,4,256], index: 8, kind: output, shape index: {}]  }
   0x1 LB: > { %s1112_s28 = sadd.s32 4294967295, %s1046_s27   ;;  %p940_p0 = scmp.ge.s32.totalorder %s1046_s27, 1  ;;  %s1046_s27 = sphi %s1106_s27, %s19_s27  }
   0x2   : > { %p228_p1 = scmp.lt.s32.totalorder %s1046_s27, 3  ;;  %s1048_s29 = smov [#allocation2]  }
   0x3   : > { %s243_s30 = sshll.u32 %s1048_s29, 4  ;;  %p1488_p3 = scmp.eq.s32.totalorder %s1112_s28, 0  ;;  %s244_s30 = int_to_ptr.vmem [resolvable:$true] %s243_s30 }
   0x4   : > { %p1116_p2 = pnand %p940_p0, %p228_p1  ;;  %s1008_s13 = scalar_lea.hbm %s1482_s3, 512 }
   0x5   : > { %p1009_p6 = scmp.ne.s32.totalorder %s1482_s3, %s1008_s13  ;;  %p1015_p10 = scmp.lt.u32.totalorder %s1008_s13, %s1482_s3 }
   0x6   : > { %s1490_s9 = scalar_select %p1116_p2, 1, 0 }
   0x7   : > { %p979_p4 = pneg %p1116_p2 }
   0x9   : > { %p1125_p5 = pnand %p1488_p3, %p979_p4 }
   0xb   : > { %p1010_p7 = pneg %p1125_p5 }
   0xd   : > { %p1011_p8 = pnand %p1010_p7, %p1009_p6 }
   0xf   : > { %p1012_p9 = pneg %p1011_p8 }
  0x11   : > { %p1017_p11 = pnand %p1015_p10, %p1012_p9 }
  0x13   : > { %1020 = shalt.err (!%p1017_p11)
}
  0x14   : > { %s1021_s18 = scalar_lea.vmem %s244_s30, 512  ;;  %p1029_p1 = scmp.lt.s32.totalorder %s244_s30, %s244_s30 }
  0x15   : > { %p1022_p12 = scmp.ne.s32.totalorder %s244_s30, %s1021_s18  ;;  %p1030_p4 = scmp.lt.s32.totalorder %s1021_s18, %s1021_s18 }
  0x17   : > { %p1024_p13 = pnand %p1022_p12, %p1010_p7  ;;  %p1031_p3 = por %p1030_p4, %p1029_p1 }
  0x19   : > { %p1025_p0 = pneg %p1024_p13 }
  0x1b   : > { %p1032_p2 = pnand %p1031_p3, %p1025_p0 }
  0x1d   : > { %1035 = shalt.err (!%p1032_p2)
}
  0x1e   : > { %s1049_s19 = smov 256   ;;  %s1050_s20 = smov 16  }
  0x1f   : > { %982 = dma.hbm_to_vmem [thread:$0]  (!%p1125_p5), %s1482_s3, 512, %s244_s30, [#allocation3], %s1049_s19, %s1049_s19, %s1050_s20  }
  0x20   : > { %p1492_p6 = scmp.ne.s32.totalorder %s1490_s9, 0 }
  0x21   : > { %p1493_p8 = scmp.eq.s32.totalorder (!%p1492_p6), %s1112_s28, 0 }
  0x22   : > { %286 = sbr.rel (%p1492_p6) target bundleno = 1021 (0x3fd), region = 52 }
  0x29   : > { %1041 = dma.done.wait (%p1493_p8), [#allocation3], 512   ;;  %p1494_p7 = pmov %p1493_p8 }
  0x2a   : > { %v1051_v0 = vmov 0.0   ;;  %v341_v1 = vld [vmem:[%s1481_s2 + $0x8] sm:$0xff]  ;;  %v343_v2 = vld [vmem:[%s1481_s2 + $0x18] sm:$0xff]  ;;  %v340_v3 = vld [vmem:[%s1481_s2] sm:$0xff]  ;;  %p324_p2 = scmp.lt.s32.totalorder %s1112_s28, 1  ;;  %vm356_vm0 = vcmask 523264   ;;  %v448_v36 = vlaneseq }
  0x2b   : > { %1043 = vsyncadd (%p1494_p7), [#allocation3], 4294966784  ;;  %424 = vmatprep.mubr.f32.mxu0 %v1051_v0  ;;  %v959_v4 = vpack.c.bf16 %v343_v2, %v341_v1  ;;  %v342_v5 = vld [vmem:[%s1481_s2 + $0x10] sm:$0xff]  ;;  %v345_v6 = vld [vmem:[%s1481_s2 + $0x28] sm:$0xff]  ;;  %vm441_vm1 = vcmask 1043456   ;;  %s1052_s23 = smov 16  }
  0x2c   : > { %v347_v7 = vld [vmem:[%s1481_s2 + $0x38] sm:$0xff]  ;;  %v961_v8 = vpack.c.bf16 %v342_v5, %v340_v3  ;;  %v344_v10 = vld [vmem:[%s1481_s2 + $0x20] sm:$0xff]  ;;  %v346_v11 = vld [vmem:[%s1481_s2 + $0x30] sm:$0xff]  ;;  %s1496_s28 = smov (!%p324_p2, %s1112_s28), 1  ;;  %s1053_s24 = smov 17   ;;  %v1058_v34 = vmov 0  }
  0x2d   : > { %v963_v9 = vpack.c.bf16 %v347_v7, %v345_v6  ;;  %v349_v12 = vld [vmem:[%s1481_s2 + $0x48] sm:$0xff]  ;;  %960 = vmatprep.subr.bf16.mxu0 %v959_v4  ;;  %v351_v13 = vld [vmem:[%s1481_s2 + $0x58] sm:$0xff]  ;;  %v965_v14 = vpack.c.bf16 %v346_v11, %v344_v10  ;;  %v348_v16 = vld [vmem:[%s1481_s2 + $0x40] sm:$0xff]  ;;  %s945_s15 = sshll.u32 %s1496_s28, 2  ;;  %s957_s19 = sshll.u32 %s1496_s28, 3  ;;  %680 = vmatprep.mubr.bf16.mxu1 %v1058_v34  ;;  %v456_v39 = vshrl.u32 %v448_v36, 7 }
  0x2e   : > { %962 = vmatpush1.bf16.msra.mxu0 %v961_v8  ;;  %v967_v15 = vpack.c.bf16 %v351_v13, %v349_v12  ;;  %v350_v17 = vld [vmem:[%s1481_s2 + $0x50] sm:$0xff]  ;;  %v353_v18 = vld [vmem:[%s1481_s2 + $0x68] sm:$0xff]  ;;  %v355_v19 = vld [vmem:[%s1481_s2 + $0x78] sm:$0xff]  ;;  %s327_s18 = scalar_lea.vmem %s1479_s0, %s945_s15  ;;  %s332_s22 = scalar_lea.vmem %s1480_s1, %s957_s19  ;;  %1006 = vset.pattern.permute.xlu0 %v1058_v34  ;;  %v1254_v40 = vand.u32 127, %v448_v36  ;;  %vm638_vm10 = vcmask 588800   ;;  %vm804_vm11 = vcmask 1041408  }
  0x2f   : > { %964 = vmatprep.subr.bf16.mxu0 %v963_v9  ;;  %v969_v20 = vpack.c.bf16 %v350_v17, %v348_v16  ;;  %v971_v21 = vpack.c.bf16 %v355_v19, %v353_v18  ;;  %v352_v22 = vld [vmem:[%s1481_s2 + $0x60] sm:$0xff]  ;;  %v354_v23 = vld [vmem:[%s1481_s2 + $0x70] sm:$0xff]  ;;  %s1054_s25 = smov 15   ;;  %s1055_s26 = smov 1   ;;  %v1256_v42 = vsub.s32 0, %v456_v39  ;;  %v1258_v44 = vsub.s32 1, %v456_v39 }
  0x30   : > { %v973_v24 = vpack.c.bf16 %v354_v23, %v352_v22  ;;  %v339_v25 = vld [vmem:[%s327_s18] sm:$0xf]  ;;  %s1056_s29 = smov 127   ;;  %s1057_s30 = smov 113   ;;  %vm471_vm2 = vcmp.lt.s32.totalorder %v1254_v40, 16  ;;  %vm493_vm3 = vcmp.lt.s32.totalorder %v1254_v40, 15 }
  0x31   : > { %v431_v27 = vld [vmem:[%s332_s22] sm:$0xff]  ;;  %s1059_s9 = smov 112   ;;  %s1060_s10 = smov 111   ;;  %vm515_vm4 = vcmp.lt.s32.totalorder %v1254_v40, 1  ;;  %vm450_vm5 = vcmp.lt.s32.totalorder %v1254_v40, 17  ;;  %vm537_vm6 = vcmp.lt.s32.totalorder %v1254_v40, 127 }
  0x32   : > { %966 = vmatpush1.bf16.msra.mxu0 %v965_v14  ;;  %v433_v30 = vcombine.high %v431_v27, %v431_v27  ;;  %v632_v35 = vld [vmem:[%s1484_s5] sm:$0xf]  ;;  %v541_v55 = vld [vmem:[#allocation2 + $0x5] ss:$8 sm:$0x3]  ;;  %vm559_vm7 = vcmp.lt.s32.totalorder %v1254_v40, 113  ;;  %s337_s22 = scalar_lea.vmem %s1487_s8, %s957_s19 }
  0x33   : > { %968 = vmatprep.subr.bf16.mxu0 %v967_v15  ;;  %v475_v45 = vld [vmem:[#allocation2 + $0x1] ss:$8 sm:$0x3]  ;;  %v519_v46 = vld [vmem:[#allocation2 + $0x3] ss:$8 sm:$0x3]  ;;  %v1292_v0 = vrot.slane %v541_v55, %v1258_v44  ;;  %v1316_v18 = vrot.slane %v541_v55, %v1256_v42 }
  0x34   : > { %v453_v47 = vld [vmem:[#allocation2] ss:$8 sm:$0x3]  ;;  %v1262_v48 = vrot.slane %v475_v45, %v1256_v42  ;;  %v497_v50 = vld [vmem:[#allocation2 + $0x2] ss:$8 sm:$0x3]  ;;  %v1265_v52 = vrot.slane %v475_v45, %v1258_v44  ;;  %v1274_v56 = vrot.slane %v519_v46, %v1258_v44  ;;  %v1287_v60 = vrot.slane %v519_v46, %v1256_v42 }
  0x35   : > { %v1278_v57 = vrot.slane %v453_v47, %v1256_v42  ;;  %v1281_v58 = vrot.slane %v453_v47, %v1258_v44  ;;  %v1284_v59 = vrot.slane %v497_v50, %v1258_v44  ;;  %v1309_v10 = vrot.slane %v497_v50, %v1256_v42  ;;  %v563_v23 = vld [vmem:[#allocation2 + $0x6] ss:$8 sm:$0x3] }
  0x36   : > { %970 = vmatpush1.bf16.msra.mxu0 %v969_v20  ;;  %vm581_vm8 = vcmp.lt.s32.totalorder %v1254_v40, 112  ;;  %vm603_vm9 = vcmp.lt.s32.totalorder %v1254_v40, 111  ;;  %v793_v40 = vld [vmem:[%s1485_s6] sm:$0x3]  ;;  %vm800_vm12 = vcmask 293888  }
  0x37   : > { %972 = vmatprep.subr.bf16.mxu0 %v971_v21 }
  0x3a   : > { %974 = vmatpush1.bf16.msra.mxu0 %v973_v24 }
  0x3d   : > { %950 = vmatmul.mubr.msk.f32.vlgmr.msra.gmra.mrb[0].mxu0 %vm356_vm0, %v339_v25  ;;  %v585_v25 = vld [vmem:[#allocation2 + $0x7] ss:$8 sm:$0x3] }
  0x3e   : > { %843 = vmatprep.mubr.bf16.mxu0 %v1058_v34  ;;  %v607_v34 = vld [vmem:[#allocation2 + $0x10] ss:$8 sm:$0x3]  ;;  %v1335_v36 = vrot.slane %v585_v25, %v1256_v42 }
 0x110   : > { %v426_v26 = vpop.f32.mrb[0].mxu0 }
 0x111   : > { %v437_v28 = vrot.slane %v426_v26, 4  ;;  %v428_v29 = vpop.f32.mrb[1].mxu0 }
 0x112   : > { %v438_v32 = vrot.slane %v428_v29, 4  ;;  %v1327_v29 = vrot.slane %v563_v23, %v1256_v42 }
 0x113   : > { %v1214_v31 = vsel %vm441_vm1, %v431_v27, %v437_v28 }
 0x114   : > { %467 = vrot.lane.b32.xlu1 %v1214_v31, %s1052_s23  ;;  %444 = vrot.lane.b32.xlu0 %v1214_v31, %s1053_s24  ;;  %v1221_v33 = vsel %vm441_vm1, %v433_v30, %v438_v32  ;;  %v1330_v30 = vrot.slane %v563_v23, %v1258_v44 }
 0x118   : > { %489 = vrot.lane.b32.xlu0 %v1214_v31, %s1054_s25  ;;  %469 = vrot.lane.b32.xlu1 %v1221_v33, %s1052_s23 }
 0x11c   : > { %511 = vrot.lane.b32.xlu0 %v1214_v31, %s1055_s26  ;;  %491 = vrot.lane.b32.xlu1 %v1221_v33, %s1054_s25 }
 0x120   : > { %513 = vrot.lane.b32.xlu1 %v1221_v33, %s1055_s26  ;;  %446 = vrot.lane.b32.xlu0 %v1221_v33, %s1053_s24 }
 0x124   : > { %535 = vrot.lane.b32.xlu1 %v1221_v33, %s1056_s29  ;;  %533 = vrot.lane.b32.xlu0 %v1214_v31, %s1056_s29 }
 0x128   : > { %557 = vrot.lane.b32.xlu1 %v1221_v33, %s1057_s30  ;;  %555 = vrot.lane.b32.xlu0 %v1214_v31, %s1057_s30 }
 0x12c   : > { %579 = vrot.lane.b32.xlu1 %v1221_v33, %s1059_s9  ;;  %577 = vrot.lane.b32.xlu0 %v1214_v31, %s1059_s9 }
 0x130   : > { %601 = vrot.lane.b32.xlu1 %v1221_v33, %s1060_s10  ;;  %599 = vrot.lane.b32.xlu0 %v1214_v31, %s1060_s10 }
 0x134   : > { %635 = vperm.xlu0 %1006, %v632_v35  }
 0x186   : > { %v468_v37 = vpop.permute.xlu1 %467  ;;  %v445_v38 = vpop.permute.xlu0 %444 }
 0x18a   : > { %v490_v41 = vpop.permute.xlu0 %489  ;;  %v470_v43 = vpop.permute.xlu1 %469 }
 0x18b   : > { %v472_v53 = vsel %vm471_vm2, %v468_v37, %v470_v43  ;;  %v473_v54 = vsel %vm471_vm2, %v470_v43, %v468_v37  ;;  %v1338_v37 = vrot.slane %v585_v25, %v1258_v44 }
 0x18c   : > { %v487_v61 = vmul.f32 %v1262_v48, %v473_v54  ;;  %v488_v1 = vmul.f32 %v1265_v52, %v472_v53 }
 0x18e   : > { %v512_v49 = vpop.permute.xlu0 %511  ;;  %v492_v51 = vpop.permute.xlu1 %491 }
 0x18f   : > { %v494_v2 = vsel %vm493_vm3, %v490_v41, %v492_v51  ;;  %v495_v11 = vsel %vm493_vm3, %v492_v51, %v490_v41 }
 0x190   : > { %v510_v12 = vmul.f32 %v1284_v59, %v494_v2  ;;  %v509_v24 = vmul.f32 %v1309_v10, %v495_v11 }
 0x192   : > { %v514_v62 = vpop.permute.xlu1 %513  ;;  %v447_v63 = vpop.permute.xlu0 %446 }
 0x193   : > { %v516_v3 = vsel %vm515_vm4, %v512_v49, %v514_v62  ;;  %v451_v4 = vsel %vm450_vm5, %v445_v38, %v447_v63  ;;  %v452_v5 = vsel %vm450_vm5, %v447_v63, %v445_v38  ;;  %v517_v6 = vsel %vm515_vm4, %v514_v62, %v512_v49 }
 0x194   : > { %v532_v7 = vmul.f32 %v1274_v56, %v516_v3  ;;  %v465_v8 = vmul.f32 %v1278_v57, %v452_v5  ;;  %v466_v9 = vmul.f32 %v1281_v58, %v451_v4  ;;  %v531_v17 = vmul.f32 %v1287_v60, %v517_v6  ;;  %v631_v5 = vld [vmem:[%s1483_s4] sm:$0x3] }
 0x195   : > { %v1354_v49 = vrot.slane %v607_v34, %v1258_v44 }
 0x196   : > { %v536_v13 = vpop.permute.xlu1 %535  ;;  %v534_v14 = vpop.permute.xlu0 %533  ;;  %v622_v15 = vpack.c.bf16 %v488_v1, %v466_v9  ;;  %v621_v16 = vpack.c.bf16 %v487_v61, %v465_v8  ;;  %v624_v22 = vpack.c.bf16 %v532_v7, %v510_v12  ;;  %v623_v32 = vpack.c.bf16 %v531_v17, %v509_v24 }
 0x197   : > { %v539_v19 = vsel %vm537_vm6, %v536_v13, %v534_v14  ;;  %v538_v20 = vsel %vm537_vm6, %v534_v14, %v536_v13 }
 0x198   : > { %v554_v21 = vmul.f32 %v1292_v0, %v539_v19  ;;  %648 = vmatprep.subr.bf16.mxu1 %v622_v15  ;;  %v553_v28 = vmul.f32 %v1316_v18, %v538_v20 }
 0x199   : > { %649 = vmatpush1.bf16.msra.mxu1 %v621_v16  ;;  %v794_v16 = vld [vmem:[%s1486_s7] sm:$0xf] }
 0x19a   : > { %v558_v26 = vpop.permute.xlu1 %557  ;;  %650 = vmatprep.subr.bf16.mxu1 %v624_v22  ;;  %v556_v27 = vpop.permute.xlu0 %555  ;;  %v626_v35 = vpack.c.bf16 %v554_v21, %v1221_v33  ;;  %v1346_v33 = vrot.slane %v607_v34, %v1256_v42  ;;  %v625_v47 = vpack.c.bf16 %v553_v28, %v1214_v31 }
 0x19b   : > { %v560_v38 = vsel %vm559_vm7, %v556_v27, %v558_v26  ;;  %v561_v39 = vsel %vm559_vm7, %v558_v26, %v556_v27 }
 0x19c   : > { %v575_v50 = vmul.f32 %v1327_v29, %v560_v38  ;;  %v576_v51 = vmul.f32 %v1330_v30, %v561_v39 }
 0x19d   : > { %651 = vmatpush1.bf16.msra.mxu1 %v623_v32 }
 0x19e   : > { %v580_v41 = vpop.permute.xlu1 %579  ;;  %652 = vmatprep.subr.bf16.mxu1 %v626_v35  ;;  %v578_v43 = vpop.permute.xlu0 %577 }
 0x19f   : > { %v582_v45 = vsel %vm581_vm8, %v578_v43, %v580_v41  ;;  %v583_v46 = vsel %vm581_vm8, %v580_v41, %v578_v43 }
 0x1a0   : > { %v597_v53 = vmul.f32 %v1335_v36, %v582_v45  ;;  %v598_v42 = vmul.f32 %v1338_v37, %v583_v46 }
 0x1a1   : > { %653 = vmatpush1.bf16.msra.mxu1 %v625_v47 }
 0x1a2   : > { %v602_v54 = vpop.permute.xlu1 %601  ;;  %v600_v55 = vpop.permute.xlu0 %599  ;;  %v628_v61 = vpack.c.bf16 %v598_v42, %v576_v51  ;;  %v627_v62 = vpack.c.bf16 %v597_v53, %v575_v50 }
 0x1a3   : > { %v604_v63 = vsel %vm603_vm9, %v600_v55, %v602_v54  ;;  %v605_v31 = vsel %vm603_vm9, %v602_v54, %v600_v55 }
 0x1a4   : > { %v619_v44 = vmul.f32 %v1346_v33, %v604_v63  ;;  %v620_v1 = vmul.f32 %v1354_v49, %v605_v31  ;;  %654 = vmatprep.subr.bf16.mxu1 %v628_v61 }
 0x1a5   : > { %655 = vmatpush1.bf16.msra.mxu1 %v627_v62 }
 0x1a6   : > { %v629_v2 = vpack.c.bf16 %v619_v44, %v619_v44  ;;  %v630_v3 = vpack.c.bf16 %v620_v1, %v620_v1 }
 0x1a8   : > { %951 = vmatprep.subr.msk.bf16.mxu1 %vm441_vm1, %v630_v3  ;;  %v643_v4 = vsel %vm441_vm1, %v629_v2, 0 }
 0x1a9   : > { %657 = vmatpush1.bf16.msra.mxu1 %v643_v4 }
 0x1ac   : > { %952 = vmatmul.mubr.msk.bf16.vlgmr.msra.gmra.mrb[0].mxu1 %vm638_vm10, %v631_v5 }
 0x1b3   : > { %v636_v6 = vpop.permute.xlu0 %635 }
 0x27f   : > { %v682_v7 = vpop.f32.mrb[0].mxu1 }
 0x280   : > { %v683_v8 = vadd.f32 %v682_v7, %v636_v6  ;;  %v684_v9 = vpop.f32.mrb[1].mxu1 }
 0x281   : > { %v686_v11 = vpop.f32.mrb[2].mxu1  ;;  %v685_v13 = vadd.f32 %v684_v9, %v636_v6 }
 0x282   : > { %v1371_v12 = vmax.f32 %v683_v8, 0.0  ;;  %v687_v14 = vpop.f32.mrb[3].mxu1 }
 0x283   : > { %v1377_v15 = vmax.f32 %v685_v13, 0.0 }
 0x284   : > { %715 = vrot.lane.b32.xlu0 %v1371_v12, %s1055_s26  ;;  %699 = vrot.lane.b32.xlu1 %v1371_v12, %s1052_s23 }
 0x288   : > { %691 = vrot.lane.b32.xlu0 %v1371_v12, %s1053_s24  ;;  %701 = vrot.lane.b32.xlu1 %v1377_v15, %s1052_s23 }
 0x28c   : > { %707 = vrot.lane.b32.xlu0 %v1371_v12, %s1054_s25  ;;  %717 = vrot.lane.b32.xlu1 %v1377_v15, %s1055_s26 }
 0x290   : > { %723 = vrot.lane.b32.xlu0 %v1371_v12, %s1056_s29  ;;  %693 = vrot.lane.b32.xlu1 %v1377_v15, %s1053_s24 }
 0x294   : > { %739 = vrot.lane.b32.xlu0 %v1371_v12, %s1059_s9  ;;  %709 = vrot.lane.b32.xlu1 %v1377_v15, %s1054_s25 }
 0x298   : > { %731 = vrot.lane.b32.xlu0 %v1371_v12, %s1057_s30  ;;  %725 = vrot.lane.b32.xlu1 %v1377_v15, %s1056_s29 }
 0x29c   : > { %747 = vrot.lane.b32.xlu0 %v1371_v12, %s1060_s10  ;;  %741 = vrot.lane.b32.xlu1 %v1377_v15, %s1059_s9 }
 0x2a0   : > { %797 = vperm.xlu0 %1006, %v794_v16   ;;  %733 = vrot.lane.b32.xlu1 %v1377_v15, %s1057_s30 }
 0x2a4   : > { %749 = vrot.lane.b32.xlu1 %v1377_v15, %s1060_s10 }
 0x2f6   : > { %v716_v17 = vpop.permute.xlu0 %715  ;;  %v700_v19 = vpop.permute.xlu1 %699 }
 0x2fa   : > { %v692_v20 = vpop.permute.xlu0 %691  ;;  %v702_v21 = vpop.permute.xlu1 %701 }
 0x2fb   : > { %v703_v24 = vsel %vm471_vm2, %v700_v19, %v702_v21  ;;  %v704_v25 = vsel %vm471_vm2, %v702_v21, %v700_v19 }
 0x2fc   : > { %v705_v32 = vmul.f32 %v704_v25, %v1262_v48  ;;  %v706_v34 = vmul.f32 %v703_v24, %v1265_v52 }
 0x2fe   : > { %v708_v22 = vpop.permute.xlu0 %707  ;;  %v718_v23 = vpop.permute.xlu1 %717  ;;  %v757_v50 = vrot.slane %v705_v32, 4  ;;  %v758_v48 = vrot.slane %v706_v34, 4 }
 0x2ff   : > { %v719_v26 = vsel %vm515_vm4, %v716_v17, %v718_v23  ;;  %v720_v27 = vsel %vm515_vm4, %v718_v23, %v716_v17 }
 0x300   : > { %v721_v39 = vmul.f32 %v720_v27, %v1287_v60  ;;  %v722_v41 = vmul.f32 %v719_v26, %v1274_v56 }
 0x302   : > { %v694_v28 = vpop.permute.xlu1 %693  ;;  %v724_v43 = vpop.permute.xlu0 %723  ;;  %v763_v53 = vrot.slane %v721_v39, 4  ;;  %v764_v42 = vrot.slane %v722_v41, 4 }
 0x303   : > { %v695_v35 = vsel %vm450_vm5, %v692_v20, %v694_v28  ;;  %v696_v38 = vsel %vm450_vm5, %v694_v28, %v692_v20 }
 0x304   : > { %v697_v45 = vmul.f32 %v696_v38, %v1278_v57  ;;  %v698_v46 = vmul.f32 %v695_v35, %v1281_v58 }
 0x306   : > { %v710_v47 = vpop.permute.xlu1 %709  ;;  %v779_v54 = vsel %vm441_vm1, %v697_v45, %v757_v50  ;;  %v740_v57 = vpop.permute.xlu0 %739  ;;  %v780_v61 = vsel %vm441_vm1, %v698_v46, %v758_v48 }
 0x307   : > { %v711_v52 = vsel %vm493_vm3, %v708_v22, %v710_v47  ;;  %v712_v51 = vsel %vm493_vm3, %v710_v47, %v708_v22 }
 0x308   : > { %v713_v60 = vmul.f32 %v712_v51, %v1309_v10  ;;  %v714_v56 = vmul.f32 %v711_v52, %v1284_v59 }
 0x30a   : > { %v781_v58 = vsel %vm441_vm1, %v713_v60, %v763_v53  ;;  %v726_v55 = vpop.permute.xlu1 %725  ;;  %v782_v62 = vsel %vm441_vm1, %v714_v56, %v764_v42  ;;  %v732_v5 = vpop.permute.xlu0 %731 }
 0x30b   : > { %v727_v63 = vsel %vm537_vm6, %v724_v43, %v726_v55  ;;  %v728_v31 = vsel %vm537_vm6, %v726_v55, %v724_v43  ;;  %v788_v44 = vpack.c.bf16 %v782_v62, %v780_v61  ;;  %v787_v10 = vpack.c.bf16 %v781_v58, %v779_v54 }
 0x30c   : > { %v729_v59 = vmul.f32 %v727_v63, %v1316_v18  ;;  %v730_v1 = vmul.f32 %v728_v31, %v1292_v0 }
 0x30d   : > { %811 = vmatprep.subr.bf16.mxu0 %v788_v44 }
 0x30e   : > { %812 = vmatpush1.bf16.msra.mxu0 %v787_v10  ;;  %v742_v2 = vpop.permute.xlu1 %741  ;;  %v769_v8 = vrot.slane %v729_v59, 4  ;;  %v770_v9 = vrot.slane %v730_v1, 4  ;;  %v748_v19 = vpop.permute.xlu0 %747 }
 0x30f   : > { %v743_v3 = vsel %vm581_vm8, %v740_v57, %v742_v2  ;;  %v744_v4 = vsel %vm581_vm8, %v742_v2, %v740_v57 }
 0x310   : > { %v745_v6 = vmul.f32 %v743_v3, %v1335_v36  ;;  %v746_v7 = vmul.f32 %v744_v4, %v1338_v37  ;;  %v783_v36 = vsel %vm441_vm1, %v1371_v12, %v769_v8  ;;  %v784_v21 = vsel %vm441_vm1, %v1377_v15, %v770_v9 }
 0x312   : > { %v734_v11 = vpop.permute.xlu1 %733  ;;  %v775_v13 = vrot.slane %v745_v6, 4  ;;  %v776_v14 = vrot.slane %v746_v7, 4 }
 0x313   : > { %v735_v18 = vsel %vm559_vm7, %v732_v5, %v734_v11  ;;  %v736_v0 = vsel %vm559_vm7, %v734_v11, %v732_v5 }
 0x314   : > { %v737_v16 = vmul.f32 %v735_v18, %v1327_v29  ;;  %v738_v17 = vmul.f32 %v736_v0, %v1330_v30 }
 0x316   : > { %v785_v37 = vsel %vm441_vm1, %v737_v16, %v775_v13  ;;  %v750_v20 = vpop.permute.xlu1 %749  ;;  %v786_v22 = vsel %vm441_vm1, %v738_v17, %v776_v14 }
 0x317   : > { %v751_v23 = vsel %vm603_vm9, %v748_v19, %v750_v20  ;;  %v752_v29 = vsel %vm603_vm9, %v750_v20, %v748_v19  ;;  %v790_v24 = vpack.c.bf16 %v786_v22, %v784_v21  ;;  %v789_v30 = vpack.c.bf16 %v785_v37, %v783_v36 }
 0x318   : > { %v753_v25 = vmul.f32 %v751_v23, %v1346_v33  ;;  %v754_v12 = vmul.f32 %v752_v29, %v1354_v49 }
 0x319   : > { %813 = vmatprep.subr.bf16.mxu0 %v790_v24 }
 0x31a   : > { %v791_v26 = vpack.c.bf16 %v753_v25, %v753_v25  ;;  %v792_v27 = vpack.c.bf16 %v754_v12, %v754_v12  ;;  %814 = vmatpush1.bf16.msra.mxu0 %v789_v30 }
 0x31c   : > { %953 = vmatprep.subr.msk.bf16.mxu0 %vm804_vm11, %v792_v27  ;;  %v806_v15 = vsel %vm804_vm11, %v791_v26, 0 }
 0x31e   : > { %816 = vmatpush1.bf16.msra.mxu0 %v806_v15 }
 0x31f   : > { %v798_v28 = vpop.permute.xlu0 %797 }
 0x321   : > { %954 = vmatmul.mubr.msk.bf16.vlgmr.msra.gmra.mrb[4].mxu0 %vm800_vm12, %v793_v40 }
 0x3f4   : > { %v845_v32 = vpop.f32.mrb[4].mxu0 }
 0x3f5   : > { %v846_v33 = vadd.f32 %v845_v32, %v798_v28  ;;  %v847_v34 = vpop.f32.mrb[5].mxu0 }
 0x3f6   : > { %v848_v49 = vadd.f32 %v847_v34, %v798_v28  ;;  %v849_v35 = vpop.f32.mrb[6].mxu0 }
 0x3f7   : > { %v852_v38 = vmax.f32 %v846_v33, 0.0  ;;  %v850_v39 = vpop.f32.mrb[7].mxu0 }
 0x3f8   : > { %v853_v41 = vmax.f32 %v848_v49, 0.0 }
 0x3fa   : > { %v856_v43 = vcombine.low %v852_v38, %v853_v41 }
 0x3fc   : > { %858 = vst [vmem:[%s337_s22] sm:$0xff] %v856_v43 }
 0x3fd PF: > { %s19_s27 = sadd.s32 1, %s1046_s27  }
 0x3fe   : > { %p16_p3 = scmp.ge.s32.totalorder %s19_s27, 4  }
 0x400   :  { %18 = sbr.rel (!%p16_p3) target bundleno = 1 (0x1), region = 97 }
 0x407   :  { %880 = vsyncpa [#allocation3], 1 }
 0x408   :  { %882 = vsyncpa [#allocation3 + $0x1], 1 }

</bundles_post_ra>
